<compile_context>
chip_gen: v7x
topology: tpu7x:2x2x1
jax: 0.10.0
libtpu: 0.0.40
codegen_flags: <defaults>
</compile_context>

<pallas_src>
import functools

import jax
import jax.numpy as jnp
from jax import lax
from jax.experimental import pallas as pl
from jax.experimental.pallas import tpu as pltpu

POOL_SIZE = 3            # module default; padding = POOL_SIZE // 2 = 1
_LANE = 128
_SUBLANE = 8


def _pool_kernel(x_ref, coef_ref, o_ref, *, width, s_valid):
    """One block of planes: y = avg_pool3x3(x) - x on the flattened spatial axis.

    x_ref    : (tb, S_in)  input planes; S_in = H*W padded to a 128 multiple.
    coef_ref : (5,  S_in)  resident f32 coefficients per spatial position:
               rows 0..3 = {left, right, up, down} tap validity masks,
               row  4    = 1 / (#valid cells in the 3x3 window).
    o_ref    : (tb, s_valid) output planes (unpadded spatial size).
    """
    xf = x_ref[...].astype(jnp.float32)            # accumulate in f32
    s_in = xf.shape[1]

    coef = coef_ref[...]
    c_l, c_r = coef[0:1, :], coef[1:2, :]          # (1, S_in): sublane broadcast
    c_u, c_d = coef[2:3, :], coef[3:4, :]
    inv_cnt = coef[4:5, :]

    def shifted(v, shift):
        # Circular lane shift on the XLU (free slot in this mem-bound kernel);
        # wrapped-in values are zeroed by the validity masks.
        return pltpu.roll(v, shift % s_in, axis=1)

    # 3-tap sum along W: neighbours are +-1 along the flattened (lane) axis.
    row_sum = xf + c_l * shifted(xf, 1) + c_r * shifted(xf, -1)
    # 3-tap sum along H: neighbours are +-W along the flattened axis.
    win_sum = row_sum + c_u * shifted(row_sum, width) + c_d * shifted(row_sum, -width)

    out = win_sum * inv_cnt - xf
    if s_valid != s_in:                            # drop spatial padding (static)
        out = out[:, :s_valid]
    o_ref[...] = out.astype(o_ref.dtype)


def _coefficients(height, width, s_in):
    """Per-position tap masks + count_include_pad=False reciprocal, shape (5, s_in)."""
    p = jnp.arange(s_in, dtype=jnp.int32)
    h = p // width
    w = p % width
    valid = p < height * width
    c_l = ((w > 0) & valid).astype(jnp.float32)
    c_r = ((w < width - 1) & valid).astype(jnp.float32)
    c_u = ((h > 0) & valid).astype(jnp.float32)
    c_d = ((h < height - 1) & valid).astype(jnp.float32)
    cnt = (1.0 + c_l + c_r) * (1.0 + c_u + c_d)    # >= 1 everywhere (pad region too)
    return jnp.stack([c_l, c_r, c_u, c_d, 1.0 / cnt], axis=0)


def _plan_rows(num_planes, s_in):
    """Planes per block: ~2 MiB f32 blocks, and >=2 grid steps when B allows it."""
    row_f32 = s_in * 4
    tb = ((2 << 20) // row_f32) // _SUBLANE * _SUBLANE
    tb = max(_SUBLANE, min(int(tb), 2048))
    half = (num_planes // 2) // _SUBLANE * _SUBLANE   # megacore: aim for grid >= 2
    if half >= _SUBLANE:
        tb = min(tb, half)
    if tb >= num_planes:
        return num_planes                             # single full-extent block
    return tb


def pooling(x):
    """PoolFormer token mixer on NCHW input:
       y = AvgPool2d(3, stride=1, padding=1, count_include_pad=False)(x) - x."""
    N, C, H, W = x.shape
    B, S = N * C, H * W
    s_in = -(-S // _LANE) * _LANE                     # lane axis padded to 128 multiple

    # Free view: (N, C, H, W) -> (B, H*W); no host transpose / relayout needed.
    x2 = x.reshape(B, S)
    if s_in != S:
        # TODO(synk): odd H*W pays one extra HBM pass for this pad; a halo'd 2-D
        # grid over (rows, planes) would avoid it for very large feature maps.
        x2 = jnp.pad(x2, ((0, 0), (0, s_in - S)))

    coef = _coefficients(H, W, s_in)
    tb = _plan_rows(B, s_in)
    grid = (pl.cdiv(B, tb),)

    blk_f32 = tb * s_in * 4
    # 2x double-buffered input + 2x output + a handful of f32 intermediates;
    # always above v5e's 16 MiB default, always below v7x's 64 MiB physical VMEM.
    vmem_limit = int(min(48 << 20, max(24 << 20, 12 * blk_f32)))

    kernel = functools.partial(_pool_kernel, width=W, s_valid=S)
    out2 = pl.pallas_call(
        kernel,
        out_shape=jax.ShapeDtypeStruct((B, S), x.dtype),
        grid=grid,
        in_specs=[
            pl.BlockSpec((tb, s_in), lambda i: (i, 0)),
            pl.BlockSpec((5, s_in), lambda i: (0, 0)),     # resident coefficients
        ],
        out_specs=pl.BlockSpec((tb, S), lambda i: (i, 0)),
        compiler_params=pltpu.CompilerParams(
            dimension_semantics=("parallel",),             # megacore shards planes
            vmem_limit_bytes=vmem_limit,
        ),
    )(x2, coef)
    return out2.reshape(N, C, H, W)


def pooling_ref(x):
    """Pure-JAX reference: nn.AvgPool2d(3,1,1,count_include_pad=False)(x) - x."""
    xf = x.astype(jnp.float32)
    dims, strides = (1, 1, POOL_SIZE, POOL_SIZE), (1, 1, 1, 1)
    pad = ((0, 0), (0, 0), (1, 1), (1, 1))
    sums = lax.reduce_window(xf, 0.0, lax.add, dims, strides, pad)
    cnts = lax.reduce_window(jnp.ones_like(xf), 0.0, lax.add, dims, strides, pad)
    return (sums / cnts - xf).astype(x.dtype)


if __name__ == "__main__":
    key0, key1 = jax.random.split(jax.random.PRNGKey(0))
    pool_fn = jax.jit(pooling)

    # Primary small NCHW test (16*16 = 256 lanes -> aligned fast path, grid=(1,)).
    x = jax.random.normal(key0, (2, 4, 16, 16), dtype=jnp.float32)
    y = jax.block_until_ready(pool_fn(x))
    assert y.shape == x.shape and y.dtype == x.dtype
    assert jnp.allclose(y, pooling_ref(x), atol=1e-5, rtol=1e-5), "mismatch (16x16)"

    # Secondary test: non-128-multiple spatial size (14*14 -> padded to 256 lanes),
    # multi-step "parallel" grid with a ragged last block (B=200 planes).
    x2 = jax.random.normal(key1, (1, 200, 14, 14), dtype=jnp.float32)
    y2 = jax.block_until_ready(pool_fn(x2))
    assert jnp.allclose(y2, pooling_ref(x2), atol=1e-5, rtol=1e-5), "mismatch (14x14)"

    print("KERNEL_OK")
</pallas_src>

<mosaic_0001>
module attributes {stable_mosaic.version = 11 : i64} {
  func.func @_pool_kernel(%arg0: i32, %arg1: memref<8x256xf32, #tpu.memory_space<vmem>>, %arg2: memref<5x256xf32, #tpu.memory_space<vmem>>, %arg3: memref<8x256xf32, #tpu.memory_space<vmem>>) attributes {dimension_semantics = [#tpu.dimension_semantics<parallel>], iteration_bounds = array<i64: 1>, scalar_prefetch = 0 : i64, scratch_operands = 0 : i64, tpu.core_type = #tpu.core_type<tc>, window_params = [{transform_indices = @transform_0, window_bounds = array<i64: 8, 256>}, {pipeline_mode = #tpu.pipeline_mode<synchronous>, transform_indices = @transform_1, window_bounds = array<i64: 5, 256>}, {transform_indices = @transform_2, window_bounds = array<i64: 8, 256>}]} {
    %c0 = arith.constant 0 : index
    %c0_0 = arith.constant 0 : index
    %0 = vector.load %arg1[%c0, %c0_0] : memref<8x256xf32, #tpu.memory_space<vmem>>, vector<8x256xf32>
    %c0_1 = arith.constant 0 : index
    %c0_2 = arith.constant 0 : index
    %1 = vector.load %arg2[%c0_1, %c0_2] : memref<5x256xf32, #tpu.memory_space<vmem>>, vector<5x256xf32>
    %2 = vector.extract_strided_slice %1 {offsets = [0, 0], sizes = [1, 256], strides = [1, 1]} : vector<5x256xf32> to vector<1x256xf32>
    %3 = vector.extract_strided_slice %1 {offsets = [1, 0], sizes = [1, 256], strides = [1, 1]} : vector<5x256xf32> to vector<1x256xf32>
    %4 = vector.extract_strided_slice %1 {offsets = [2, 0], sizes = [1, 256], strides = [1, 1]} : vector<5x256xf32> to vector<1x256xf32>
    %5 = vector.extract_strided_slice %1 {offsets = [3, 0], sizes = [1, 256], strides = [1, 1]} : vector<5x256xf32> to vector<1x256xf32>
    %6 = vector.extract_strided_slice %1 {offsets = [4, 0], sizes = [1, 256], strides = [1, 1]} : vector<5x256xf32> to vector<1x256xf32>
    %c1_i32 = arith.constant 1 : i32
    %7 = tpu.dynamic_rotate %0 by %c1_i32 dim 1 : vector<8x256xf32>, i32 -> vector<8x256xf32>
    %8 = vector.broadcast %2 : vector<1x256xf32> to vector<8x256xf32>
    %9 = arith.mulf %8, %7 : vector<8x256xf32>
    %10 = arith.addf %0, %9 : vector<8x256xf32>
    %c255_i32 = arith.constant 255 : i32
    %11 = tpu.dynamic_rotate %0 by %c255_i32 dim 1 : vector<8x256xf32>, i32 -> vector<8x256xf32>
    %12 = vector.broadcast %3 : vector<1x256xf32> to vector<8x256xf32>
    %13 = arith.mulf %12, %11 : vector<8x256xf32>
    %14 = arith.addf %10, %13 : vector<8x256xf32>
    %c16_i32 = arith.constant 16 : i32
    %15 = tpu.dynamic_rotate %14 by %c16_i32 dim 1 : vector<8x256xf32>, i32 -> vector<8x256xf32>
    %16 = vector.broadcast %4 : vector<1x256xf32> to vector<8x256xf32>
    %17 = arith.mulf %16, %15 : vector<8x256xf32>
    %18 = arith.addf %14, %17 : vector<8x256xf32>
    %c240_i32 = arith.constant 240 : i32
    %19 = tpu.dynamic_rotate %14 by %c240_i32 dim 1 : vector<8x256xf32>, i32 -> vector<8x256xf32>
    %20 = vector.broadcast %5 : vector<1x256xf32> to vector<8x256xf32>
    %21 = arith.mulf %20, %19 : vector<8x256xf32>
    %22 = arith.addf %18, %21 : vector<8x256xf32>
    %23 = vector.broadcast %6 : vector<1x256xf32> to vector<8x256xf32>
    %24 = arith.mulf %22, %23 : vector<8x256xf32>
    %25 = arith.subf %24, %0 : vector<8x256xf32>
    %c0_3 = arith.constant 0 : index
    %c0_4 = arith.constant 0 : index
    %26 = vector.load %arg3[%c0_3, %c0_4] : memref<8x256xf32, #tpu.memory_space<vmem>>, vector<8x256xf32>
    tpu.vector_store %arg3[%c0_3, %c0_4], %25 {strides = array<i32>} : memref<8x256xf32, #tpu.memory_space<vmem>>, vector<8x256xf32>,
    return
  }
  func.func @transform_0(%arg0: i32) -> (i32, i32) {
    %c0_i32 = arith.constant 0 : i32
    %c0_i32_0 = arith.constant 0 : i32
    return %arg0, %c0_i32 : i32, i32
  }
  func.func @transform_1(%arg0: i32) -> (i32, i32) {
    %c0_i32 = arith.constant 0 : i32
    %c0_i32_0 = arith.constant 0 : i32
    %c0_i32_1 = arith.constant 0 : i32
    return %c0_i32, %c0_i32_0 : i32, i32
  }
  func.func @transform_2(%arg0: i32) -> (i32, i32) {
    %c0_i32 = arith.constant 0 : i32
    %c0_i32_0 = arith.constant 0 : i32
    return %arg0, %c0_i32 : i32, i32
  }
}

</mosaic_0001>

<bundles_post_ra>
// kernel: pooling.1
= control target key start
LH: loop header
LB: loop body
LE: loop exit
PB: predicated region body
PF: predicated region fallthrough
CT: control target
= control target key end

     0   :  { %s115_s11 = smov 127   ;;  %s116_s12 = smov 1   ;;  %v19_v2 = vlaneseq  ;;  %s164_s0 = inlined_call_operand.vmem [shape: f32[8,256], index: 0, kind: input, shape index: {}]   ;;  %s165_s1 = inlined_call_operand.vmem [shape: f32[5,256], index: 1, kind: input, shape index: {}]   ;;  %s166_s2 = inlined_call_operand.vmem [shape: f32[8,256], index: 2, kind: output, shape index: {}]  }
   0x1   :  { %v137_v0 = vld [vmem:[%s164_s0] sm:$0xff]  ;;  %v144_v1 = vld [vmem:[%s164_s0 + $0x8] sm:$0xff]  ;;  %s117_s0 = smov 16  }
   0x2   :  { %36 = vrot.lane.b32.xlu1 %v137_v0, %s115_s11  ;;  %15 = vrot.lane.b32.xlu0 %v137_v0, %s116_s12  ;;  %v25_v3 = vshrl.u32 %v19_v2, 7  ;;  %v20_v4 = vand.u32 127, %v19_v2  ;;  %v13_v6 = vld [vmem:[%s165_s1] sm:$0x1f]  ;;  %v14_v7 = vld [vmem:[%s165_s1 + $0x8] sm:$0x1f] }
   0x3   :  { %s118_s1 = smov 112  }
   0x4   :  { %v26_v5 = vsub.s32 0, %v25_v3  ;;  %v45_v10 = vsub.s32 1, %v25_v3  ;;  %vm40_vm0 = vcmp.lt.s32.totalorder %v20_v4, 127  ;;  %vm21_vm1 = vcmp.lt.s32.totalorder %v20_v4, 1 }
   0x5   :  { %v64_v29 = vsub.s32 2, %v25_v3  ;;  %vm59_vm2 = vcmp.lt.s32.totalorder %v20_v4, 16  ;;  %v83_v32 = vsub.s32 3, %v25_v3  ;;  %vm78_vm3 = vcmp.lt.s32.totalorder %v20_v4, 112 }
   0x6   :  { %38 = vrot.lane.b32.xlu1 %v144_v1, %s115_s11  ;;  %17 = vrot.lane.b32.xlu0 %v144_v1, %s116_s12  ;;  %v27_v11 = vrot.slane %v13_v6, %v26_v5  ;;  %v31_v12 = vrot.slane %v14_v7, %v26_v5  ;;  %v46_v13 = vrot.slane %v13_v6, %v45_v10  ;;  %v95_v37 = vsub.s32 4, %v25_v3 }
   0x7   :  { %v50_v14 = vrot.slane %v14_v7, %v45_v10  ;;  %v65_v30 = vrot.slane %v13_v6, %v64_v29  ;;  %v69_v31 = vrot.slane %v14_v7, %v64_v29  ;;  %v84_v40 = vrot.slane %v13_v6, %v83_v32 }
   0x8   :  { %v88_v41 = vrot.slane %v14_v7, %v83_v32  ;;  %v96_v44 = vrot.slane %v13_v6, %v95_v37  ;;  %v100_v45 = vrot.slane %v14_v7, %v95_v37 }
  0x74   :  { %v37_v8 = vpop.permute.xlu1 %36  ;;  %v16_v9 = vpop.permute.xlu0 %15 }
  0x78   :  { %v39_v15 = vpop.permute.xlu1 %38  ;;  %v18_v16 = vpop.permute.xlu0 %17 }
  0x79   :  { %v41_v17 = vsel %vm40_vm0, %v37_v8, %v39_v15  ;;  %v42_v18 = vsel %vm40_vm0, %v39_v15, %v37_v8  ;;  %v22_v19 = vsel %vm21_vm1, %v16_v9, %v18_v16  ;;  %v23_v20 = vsel %vm21_vm1, %v18_v16, %v16_v9 }
  0x7a   :  { %v32_v21 = vmul.f32 %v27_v11, %v23_v20  ;;  %v33_v22 = vmul.f32 %v31_v12, %v22_v19  ;;  %v51_v23 = vmul.f32 %v46_v13, %v41_v17  ;;  %v52_v24 = vmul.f32 %v50_v14, %v42_v18 }
  0x7c   :  { %v34_v25 = vadd.f32 %v32_v21, %v137_v0  ;;  %v35_v26 = vadd.f32 %v33_v22, %v144_v1 }
  0x7e   :  { %v53_v27 = vadd.f32 %v51_v23, %v34_v25  ;;  %v54_v28 = vadd.f32 %v52_v24, %v35_v26 }
  0x80   :  { %55 = vrot.lane.b32.xlu0 %v53_v27, %s117_s0  ;;  %57 = vrot.lane.b32.xlu1 %v54_v28, %s117_s0 }
  0x84   :  { %74 = vrot.lane.b32.xlu0 %v53_v27, %s118_s1  ;;  %76 = vrot.lane.b32.xlu1 %v54_v28, %s118_s1 }
  0xf2   :  { %v56_v33 = vpop.permute.xlu0 %55  ;;  %v58_v34 = vpop.permute.xlu1 %57 }
  0xf3   :  { %v60_v35 = vsel %vm59_vm2, %v56_v33, %v58_v34  ;;  %v61_v36 = vsel %vm59_vm2, %v58_v34, %v56_v33 }
  0xf4   :  { %v70_v38 = vmul.f32 %v65_v30, %v61_v36  ;;  %v71_v39 = vmul.f32 %v69_v31, %v60_v35 }
  0xf6   :  { %v75_v42 = vpop.permute.xlu0 %74  ;;  %v77_v43 = vpop.permute.xlu1 %76  ;;  %v72_v48 = vadd.f32 %v70_v38, %v53_v27  ;;  %v73_v49 = vadd.f32 %v71_v39, %v54_v28 }
  0xf7   :  { %v79_v46 = vsel %vm78_vm3, %v75_v42, %v77_v43  ;;  %v80_v47 = vsel %vm78_vm3, %v77_v43, %v75_v42 }
  0xf8   :  { %v89_v50 = vmul.f32 %v84_v40, %v79_v46  ;;  %v90_v51 = vmul.f32 %v88_v41, %v80_v47 }
  0xfa   :  { %v91_v52 = vadd.f32 %v89_v50, %v72_v48  ;;  %v92_v53 = vadd.f32 %v90_v51, %v73_v49 }
  0xfc   :  { %v101_v54 = vmul.f32 %v96_v44, %v91_v52  ;;  %v102_v55 = vmul.f32 %v100_v45, %v92_v53 }
  0xfe   :  { %v103_v56 = vsub.f32 %v101_v54, %v137_v0  ;;  %v104_v57 = vsub.f32 %v102_v55, %v144_v1 }
 0x100   :  { %105 = vst [vmem:[%s166_s2] sm:$0xff] %v103_v56  ;;  %106 = vst [vmem:[%s166_s2 + $0x8] sm:$0xff] %v104_v57 }

</bundles_post_ra>
